<compile_context>
chip_gen: v7x
topology: tpu7x:2x2x1
jax: 0.10.0
libtpu: 0.0.40
codegen_flags: <defaults>
</compile_context>

<pallas_src>
import functools

import jax
import jax.numpy as jnp
from jax.experimental import pallas as pl
from jax.experimental.pallas import tpu as pltpu


def _int_pow(x, n):
    """x ** n for small positive integer n via squaring (VALU-only)."""
    acc = None
    base = x
    while n > 0:
        if n & 1:
            acc = base if acc is None else acc * base
        n >>= 1
        if n:
            base = base * base
    return acc


def _gem_kernel(x_ref, o_ref, *, p, p_is_int, inv_hw, eps):
    # x_ref: (TILE_NC, HW) tile in VMEM (input dtype).
    # clamp in input dtype (matches torch), accumulate in f32.
    xc = jnp.maximum(x_ref[...], eps).astype(jnp.float32)

    if p_is_int:
        xp = _int_pow(xc, int(round(p)))          # multiplies only, no exp/log
    else:
        xp = jnp.power(xc, p)                     # generic path -> EUP

    # adaptive_avg_pool2d to (1,1) == mean over the spatial (lane) axis.
    m = jnp.sum(xp, axis=-1, keepdims=True) * inv_hw   # (TILE_NC, 1) f32

    if p == 1.0:
        r = m
    elif p == 2.0:
        r = jnp.sqrt(m)
    elif p == 4.0:
        r = jnp.sqrt(jnp.sqrt(m))
    else:
        r = jnp.power(m, 1.0 / p)                 # tiny (TILE_NC, 1) operand

    o_ref[...] = r.astype(o_ref.dtype)


def generalized_mean_pooling(x, norm=2.0, eps=1e-6, output_size=(1, 1)):
    """x: (N, C, H, W) float -> (N, C, 1, 1), same dtype as x."""
    # TODO(synk): only global pooling (output_size == (1,1)) is implemented;
    # general adaptive output sizes would need per-window index maps.
    assert output_size in ((1, 1), 1), "only (1, 1) output_size supported"

    n, c, h, w = x.shape
    nc, hw = n * c, h * w
    x2d = x.reshape(nc, hw)                       # free reshape for NCHW-contiguous

    p = float(norm)
    p_is_int = abs(p - round(p)) < 1e-9 and 1 <= round(p) <= 16

    # --- tile sizing: ~4 MiB of f32 footprint per tile, using the lane-padded
    # row width that the VMEM layout actually occupies. Double-buffered inputs
    # plus f32 elementwise temporaries stay < ~24 MiB scoped VMEM.
    hw_padded = pl.cdiv(hw, 128) * 128
    target_f32_bytes = 4 * 1024 * 1024
    rows = max(8, (target_f32_bytes // (hw_padded * 4)) // 8 * 8)
    tile_nc = min(rows, pl.cdiv(nc, 8) * 8)
    # TODO(synk): for extremely large H*W (row >> 4 MiB) add a second grid axis
    # over HW with an accumulator scratch instead of one row-tile per step.

    grid = (pl.cdiv(nc, tile_nc),)

    itemsize = jnp.dtype(x.dtype).itemsize
    cost = pl.CostEstimate(
        flops=3 * nc * hw,
        transcendentals=0 if p_is_int else 2 * nc * hw,
        bytes_accessed=nc * hw * itemsize + nc * itemsize,
    )

    out = pl.pallas_call(
        functools.partial(
            _gem_kernel, p=p, p_is_int=p_is_int, inv_hw=1.0 / float(hw),
            eps=float(eps),
        ),
        out_shape=jax.ShapeDtypeStruct((nc, 1), x.dtype),
        grid=grid,
        in_specs=[pl.BlockSpec((tile_nc, hw), lambda i: (i, 0))],
        out_specs=pl.BlockSpec((tile_nc, 1), lambda i: (i, 0)),
        compiler_params=pltpu.CompilerParams(
            dimension_semantics=("parallel",),
            vmem_limit_bytes=32 * 1024 * 1024,
        ),
        cost_estimate=cost,
    )(x2d)

    return out.reshape(n, c, 1, 1)


def _reference(x, norm=2.0, eps=1e-6):
    xc = jnp.maximum(x.astype(jnp.float32), eps)
    xp = jnp.power(xc, norm)
    m = jnp.mean(xp, axis=(2, 3), keepdims=True)
    return jnp.power(m, 1.0 / norm).astype(x.dtype)


if __name__ == "__main__":
    key = jax.random.PRNGKey(0)

    # Small NCHW input consistent with the module's forward.
    x = jax.random.normal(key, (2, 4, 16, 16), dtype=jnp.float32)

    # Default p=2 path (x*x + sqrt).
    y = generalized_mean_pooling(x, norm=2.0, eps=1e-6)
    y = jax.block_until_ready(y)
    y_ref = _reference(x, norm=2.0, eps=1e-6)
    assert y.shape == (2, 4, 1, 1), y.shape
    assert jnp.allclose(y, y_ref, atol=1e-5, rtol=1e-5)

    # Integer p=3 path (exponentiation by squaring + generic root).
    y3 = generalized_mean_pooling(x, norm=3.0, eps=1e-6)
    y3 = jax.block_until_ready(y3)
    y3_ref = _reference(x, norm=3.0, eps=1e-6)
    assert jnp.allclose(y3, y3_ref, atol=1e-4, rtol=1e-4)

    # Non-integer p (exercises the jnp.power / EUP branch).
    y25 = generalized_mean_pooling(x, norm=2.5, eps=1e-6)
    y25 = jax.block_until_ready(y25)
    y25_ref = _reference(x, norm=2.5, eps=1e-6)
    assert jnp.allclose(y25, y25_ref, atol=1e-4, rtol=1e-4)

    # NC not a multiple of the tile (exercises partial-block masking, no pad)
    # and bf16 input streaming.
    x2 = jax.random.normal(jax.random.PRNGKey(1), (2, 3, 16, 16), dtype=jnp.bfloat16)
    y2 = generalized_mean_pooling(x2, norm=2.0, eps=1e-6)
    y2 = jax.block_until_ready(y2)
    y2_ref = _reference(x2, norm=2.0, eps=1e-6)
    assert y2.shape == (2, 3, 1, 1), y2.shape
    assert jnp.allclose(
        y2.astype(jnp.float32), y2_ref.astype(jnp.float32), atol=2e-2, rtol=2e-2
    )

    print("KERNEL_OK")
</pallas_src>

<mosaic_0001>
module attributes {stable_mosaic.version = 11 : i64} {
  func.func @_gem_kernel(%arg0: i32, %arg1: memref<8x256xf32, #tpu.memory_space<vmem>>, %arg2: memref<8x1xf32, #tpu.memory_space<vmem>>) attributes {dimension_semantics = [#tpu.dimension_semantics<parallel>], iteration_bounds = array<i64: 1>, scalar_prefetch = 0 : i64, scratch_operands = 0 : i64, tpu.core_type = #tpu.core_type<tc>, window_params = [{transform_indices = @transform_0, window_bounds = array<i64: 8, 256>}, {transform_indices = @transform_1, window_bounds = array<i64: 8, 1>}]} {
    %c0 = arith.constant 0 : index
    %c0_0 = arith.constant 0 : index
    %0 = vector.load %arg1[%c0, %c0_0] : memref<8x256xf32, #tpu.memory_space<vmem>>, vector<8x256xf32>
    %cst = arith.constant 9.99999997E-7 : f32
    %1 = vector.broadcast %cst : f32 to vector<8x256xf32>
    %2 = arith.maximumf %0, %1 : vector<8x256xf32>
    %3 = arith.mulf %2, %2 : vector<8x256xf32>
    %cst_1 = arith.constant dense<0.000000e+00> : vector<8xf32>
    %4 = vector.multi_reduction <add>, %3, %cst_1 [1] : vector<8x256xf32> to vector<8xf32>
    %5 = vector.shape_cast %4 : vector<8xf32> to vector<8x1xf32>
    %cst_2 = arith.constant 3.906250e-03 : f32
    %6 = vector.broadcast %cst_2 : f32 to vector<8x1xf32>
    %7 = arith.mulf %5, %6 : vector<8x1xf32>
    %8 = math.sqrt %7 : vector<8x1xf32>
    %c0_3 = arith.constant 0 : index
    %c0_4 = arith.constant 0 : index
    %9 = vector.load %arg2[%c0_3, %c0_4] : memref<8x1xf32, #tpu.memory_space<vmem>>, vector<8x1xf32>
    tpu.vector_store %arg2[%c0_3, %c0_4], %8 {strides = array<i32>} : memref<8x1xf32, #tpu.memory_space<vmem>>, vector<8x1xf32>,
    return
  }
  func.func @transform_0(%arg0: i32) -> (i32, i32) {
    %c0_i32 = arith.constant 0 : i32
    %c0_i32_0 = arith.constant 0 : i32
    return %arg0, %c0_i32 : i32, i32
  }
  func.func @transform_1(%arg0: i32) -> (i32, i32) {
    %c0_i32 = arith.constant 0 : i32
    %c0_i32_0 = arith.constant 0 : i32
    return %arg0, %c0_i32 : i32, i32
  }
}

</mosaic_0001>

<bundles_post_ra>
// kernel: tpu_custom_call.1
= control target key start
LH: loop header
LB: loop body
LE: loop exit
PB: predicated region body
PF: predicated region fallthrough
CT: control target
= control target key end

     0   :  { %6 = vsyncpa [#allocation3], 0  ;;  %s71_s6 = smov [#allocation2]   ;;  %s97_s0 = inlined_call_operand.hbm [shape: f32[8,256], index: 0, kind: input, shape index: {}]   ;;  %s98_s1 = inlined_call_operand.vmem [shape: f32[8,1], index: 1, kind: output, shape index: {}]  }
   0x1   :  { %s13_s7 = sshll.u32 %s71_s6, 4  ;;  %s47_s10 = scalar_lea.hbm %s97_s0, 256  ;;  %s14_s7 = int_to_ptr.vmem [resolvable:$true] %s13_s7 }
   0x2   :  { %p48_p0 = scmp.ne.s32.totalorder %s97_s0, %s47_s10  ;;  %p51_p1 = scmp.lt.u32.totalorder %s47_s10, %s97_s0 }
   0x4   :  { %p53_p2 = pnand %p51_p1, %p48_p0 }
   0x6   :  { %56 = shalt.err (!%p53_p2)
}
   0x7   :  { %s57_s15 = scalar_lea.vmem %s14_s7, 256  ;;  %p62_p4 = scmp.lt.s32.totalorder %s14_s7, %s14_s7 }
   0x8   :  { %p58_p3 = scmp.ne.s32.totalorder %s14_s7, %s57_s15  ;;  %p63_p5 = scmp.lt.s32.totalorder %s57_s15, %s57_s15 }
   0xa   :  { %p64_p6 = por %p63_p5, %p62_p4 }
   0xc   :  { %p65_p7 = pnand %p64_p6, %p58_p3 }
   0xe   :  { %68 = shalt.err (!%p65_p7)
}
   0xf   :  { %16 = dma.hbm_to_vmem [thread:$0]  %s97_s0, 256, %s14_s7, [#allocation3]  }
  0x10   :  { %69 = dma.done.wait [#allocation3], 256  }
  0x11   :  { %70 = vsyncadd [#allocation3], 4294967040  ;;  %v20_v0 = vld [vmem:[#allocation2] sm:$0xff]  ;;  %v21_v1 = vld [vmem:[#allocation2 + $0x8] sm:$0xff]  ;;  %vm37_vm1 = vcmask 7168  }
  0x12   :  { %v22_v2 = vmax.f32 %v20_v0, 1e-06  ;;  %v23_v3 = vmax.f32 %v21_v1, 1e-06 }
  0x14   :  { %v24_v4 = vmul.f32 %v22_v2, %v22_v2  ;;  %v25_v5 = vmul.f32 %v23_v3, %v23_v3 }
  0x16   :  { %v26_v6 = vadd.f32 %v25_v5, %v24_v4 }
  0x18   :  { %27 = vadd.xlane.f32.xlu0 %v26_v6 }
  0xa5   :  { %v28_v7 = vpop.xlane.xlu0 %27 }
  0xa6   :  { %v29_v8 = vmul.f32 0.00390625, %v28_v7 }
  0xa8   :  { %45 = vrsqrt.f32 %v29_v8  ;;  %vm32_vm0 = vcmp.eq.f32.partialorder %v29_v8, inf  ;;  %v35_v11 = vand.u32 2147483648, %v29_v8  ;;  %vm34_vm2 = vcmp.eq.f32.partialorder %v29_v8, 0.0 }
  0xb2   :  { %v46_v9 = vpop.eup %45 }
  0xb3   :  { %v31_v10 = vmul.f32 %v46_v9, %v29_v8 }
  0xb5   :  { %v33_v12 = vsel %vm32_vm0, %v29_v8, %v31_v10 }
  0xb6   :  { %v36_v13 = vsel %vm34_vm2, %v35_v11, %v33_v12 }
  0xb7   :  { %38 = vst.msk [vmem:[%s98_s1] sm:$0xff] %vm37_vm1, %v36_v13 }
  0xb8   :  { %43 = vsyncpa [#allocation3], 1 }

</bundles_post_ra>
